<compile_context>
chip_gen: v7x
topology: tpu7x:2x2x1
jax: 0.10.0
libtpu: 0.0.40
codegen_flags: <defaults>
</compile_context>

<pallas_src>
import jax
import jax.numpy as jnp
import numpy as np
from jax.experimental import pallas as pl
from jax.experimental.pallas import tpu as pltpu


def _dwt_concat_kernel(x_ref, ll_ref, det_ref):
    """Haar DWT downsample of RT output rows for one batch element.

    x_ref:   VMEM (1, RT, 2, W/2, 2C)  -- lanes hold [even-col chans | odd-col chans]
    ll_ref:  VMEM (1, RT, W/2, C)      -- LL band
    det_ref: VMEM (1, RT, W/2, C)      -- LH + HL + HH band
    """
    c = ll_ref.shape[-1]
    row0 = x_ref[0, :, 0, :, :].astype(jnp.float32)   # (RT, W/2, 2C): [a | b]
    row1 = x_ref[0, :, 1, :, :].astype(jnp.float32)   # (RT, W/2, 2C): [c | d]

    s = row0 + row1                                   # [a+c | b+d]
    ll = 0.5 * (s[..., :c] + s[..., c:])              # 0.5*(a+b+c+d)
    det = 2.0 * row0[..., :c] - ll                    # 1.5a - 0.5(b+c+d)

    ll_ref[0] = ll.astype(ll_ref.dtype)
    det_ref[0] = det.astype(det_ref.dtype)


def _pick_row_tile(h_half, bytes_per_row_pair, batch):
    """Largest divisor of h_half whose input block stays under ~2 MiB."""
    budget = 2 * 1024 * 1024
    max_rt = max(1, budget // max(1, bytes_per_row_pair))
    rt = 1
    for d in range(1, h_half + 1):
        if h_half % d == 0 and d <= max_rt:
            rt = d
    # Keep the grid at >= 2 steps when B == 1 so both v7x TensorCores get work.
    if batch == 1 and rt == h_half:
        for d in range(h_half - 1, 0, -1):
            if h_half % d == 0:
                rt = d
                break
    return rt


def downsample_concat_nhwc(x_nhwc, wavename: str = "haar"):
    """NHWC-native entry point (no layout glue). Returns (LL, DET) in NHWC."""
    # TODO(synk): only the 'haar' (2-tap) wavelet bank is implemented here.
    assert wavename == "haar"
    B, H, W, C = x_nhwc.shape
    assert H % 2 == 0 and W % 2 == 0
    h_half, w_half = H // 2, W // 2

    # Pure metadata reshape: even/odd H rows and even/odd W columns become
    # dense axes -> the kernel never needs strided loads.
    x5 = x_nhwc.reshape(B, h_half, 2, w_half, 2 * C)

    itemsize = jnp.dtype(x_nhwc.dtype).itemsize
    rt = _pick_row_tile(h_half, 2 * w_half * 2 * C * itemsize, B)

    ll, det = pl.pallas_call(
        _dwt_concat_kernel,
        out_shape=(
            jax.ShapeDtypeStruct((B, h_half, w_half, C), x_nhwc.dtype),
            jax.ShapeDtypeStruct((B, h_half, w_half, C), x_nhwc.dtype),
        ),
        grid=(B, h_half // rt),
        in_specs=[
            pl.BlockSpec((1, rt, 2, w_half, 2 * C),
                         lambda b, i: (b, i, 0, 0, 0)),
        ],
        out_specs=(
            pl.BlockSpec((1, rt, w_half, C), lambda b, i: (b, i, 0, 0)),
            pl.BlockSpec((1, rt, w_half, C), lambda b, i: (b, i, 0, 0)),
        ),
        compiler_params=pltpu.CompilerParams(
            dimension_semantics=("parallel", "parallel")),
    )(x5)
    return ll, det


def downsample_concat(x_nchw, wavename: str = "haar"):
    """NCHW wrapper matching the PyTorch module: (B,C,H,W) -> (B,2C,H/2,W/2)."""
    B, C, H, W = x_nchw.shape
    # Layout glue for NCHW callers; NHWC callers should use downsample_concat_nhwc
    # directly and skip both transposes.
    x_nhwc = jnp.transpose(x_nchw, (0, 2, 3, 1))
    ll, det = downsample_concat_nhwc(x_nhwc, wavename)
    # NHWC -> NCHW; the channel concat is just stacking along dim 1 here.
    ll_nchw = jnp.transpose(ll, (0, 3, 1, 2))
    det_nchw = jnp.transpose(det, (0, 3, 1, 2))
    return jnp.concatenate([ll_nchw, det_nchw], axis=1)


def _reference(x_nchw):
    """Pure-JAX reference of the same Haar DWT + concat."""
    B, C, H, W = x_nchw.shape
    xr = x_nchw.reshape(B, C, H // 2, 2, W // 2, 2)
    a = xr[:, :, :, 0, :, 0]
    b = xr[:, :, :, 0, :, 1]
    c = xr[:, :, :, 1, :, 0]
    d = xr[:, :, :, 1, :, 1]
    ll = 0.5 * (a + b + c + d)
    det = 1.5 * a - 0.5 * (b + c + d)   # LH + HL + HH for Haar
    return jnp.concatenate([ll, det], axis=1)


if __name__ == "__main__":
    key = jax.random.PRNGKey(0)
    B, C, H, W = 2, 4, 16, 16
    x = jax.random.normal(key, (B, C, H, W), dtype=jnp.float32)

    out = downsample_concat(x)
    out = jax.block_until_ready(out)

    ref = jax.block_until_ready(_reference(x))
    assert out.shape == (B, 2 * C, H // 2, W // 2), out.shape
    np.testing.assert_allclose(np.asarray(out), np.asarray(ref),
                               rtol=1e-5, atol=1e-5)
    print("KERNEL_OK")
</pallas_src>

<mosaic_0001>
module attributes {stable_mosaic.version = 11 : i64} {
  func.func @_dwt_concat_kernel(%arg0: i32, %arg1: i32, %arg2: memref<1x8x2x8x8xf32, #tpu.memory_space<vmem>>, %arg3: memref<1x8x8x4xf32, #tpu.memory_space<vmem>>, %arg4: memref<1x8x8x4xf32, #tpu.memory_space<vmem>>) attributes {dimension_semantics = [#tpu.dimension_semantics<parallel>, #tpu.dimension_semantics<parallel>], iteration_bounds = array<i64: 2, 1>, scalar_prefetch = 0 : i64, scratch_operands = 0 : i64, tpu.core_type = #tpu.core_type<tc>, window_params = [{transform_indices = @transform_0, window_bounds = array<i64: 1, 8, 2, 8, 8>}, {transform_indices = @transform_1, window_bounds = array<i64: 1, 8, 8, 4>}, {transform_indices = @transform_2, window_bounds = array<i64: 1, 8, 8, 4>}]} {
    %c0 = arith.constant 0 : index
    %c0_0 = arith.constant 0 : index
    %c0_1 = arith.constant 0 : index
    %c0_2 = arith.constant 0 : index
    %c0_3 = arith.constant 0 : index
    %0 = vector.load %arg2[%c0, %c0_0, %c0_1, %c0_2, %c0_3] : memref<1x8x2x8x8xf32, #tpu.memory_space<vmem>>, vector<1x8x1x8x8xf32>
    %1 = vector.shape_cast %0 : vector<1x8x1x8x8xf32> to vector<8x8x8xf32>
    %c0_4 = arith.constant 0 : index
    %c0_5 = arith.constant 0 : index
    %c1 = arith.constant 1 : index
    %c0_6 = arith.constant 0 : index
    %c0_7 = arith.constant 0 : index
    %2 = vector.load %arg2[%c0_4, %c0_5, %c1, %c0_6, %c0_7] : memref<1x8x2x8x8xf32, #tpu.memory_space<vmem>>, vector<1x8x1x8x8xf32>
    %3 = vector.shape_cast %2 : vector<1x8x1x8x8xf32> to vector<8x8x8xf32>
    %4 = arith.addf %1, %3 : vector<8x8x8xf32>
    %5 = vector.extract_strided_slice %4 {offsets = [0, 0, 0], sizes = [8, 8, 4], strides = [1, 1, 1]} : vector<8x8x8xf32> to vector<8x8x4xf32>
    %6 = vector.extract_strided_slice %4 {offsets = [0, 0, 4], sizes = [8, 8, 4], strides = [1, 1, 1]} : vector<8x8x8xf32> to vector<8x8x4xf32>
    %7 = arith.addf %5, %6 : vector<8x8x4xf32>
    %cst = arith.constant 5.000000e-01 : f32
    %8 = vector.broadcast %cst : f32 to vector<8x8x4xf32>
    %9 = arith.mulf %8, %7 : vector<8x8x4xf32>
    %10 = vector.extract_strided_slice %1 {offsets = [0, 0, 0], sizes = [8, 8, 4], strides = [1, 1, 1]} : vector<8x8x8xf32> to vector<8x8x4xf32>
    %cst_8 = arith.constant 2.000000e+00 : f32
    %11 = vector.broadcast %cst_8 : f32 to vector<8x8x4xf32>
    %12 = arith.mulf %11, %10 : vector<8x8x4xf32>
    %13 = arith.subf %12, %9 : vector<8x8x4xf32>
    %c0_9 = arith.constant 0 : index
    %c0_10 = arith.constant 0 : index
    %c0_11 = arith.constant 0 : index
    %c0_12 = arith.constant 0 : index
    %14 = vector.load %arg3[%c0_9, %c0_10, %c0_11, %c0_12] : memref<1x8x8x4xf32, #tpu.memory_space<vmem>>, vector<1x8x8x4xf32>
    %15 = vector.shape_cast %14 : vector<1x8x8x4xf32> to vector<8x8x4xf32>
    %16 = vector.shape_cast %9 : vector<8x8x4xf32> to vector<1x8x8x4xf32>
    tpu.vector_store %arg3[%c0_9, %c0_10, %c0_11, %c0_12], %16 {strides = array<i32>} : memref<1x8x8x4xf32, #tpu.memory_space<vmem>>, vector<1x8x8x4xf32>,
    %c0_13 = arith.constant 0 : index
    %c0_14 = arith.constant 0 : index
    %c0_15 = arith.constant 0 : index
    %c0_16 = arith.constant 0 : index
    %17 = vector.load %arg4[%c0_13, %c0_14, %c0_15, %c0_16] : memref<1x8x8x4xf32, #tpu.memory_space<vmem>>, vector<1x8x8x4xf32>
    %18 = vector.shape_cast %17 : vector<1x8x8x4xf32> to vector<8x8x4xf32>
    %19 = vector.shape_cast %13 : vector<8x8x4xf32> to vector<1x8x8x4xf32>
    tpu.vector_store %arg4[%c0_13, %c0_14, %c0_15, %c0_16], %19 {strides = array<i32>} : memref<1x8x8x4xf32, #tpu.memory_space<vmem>>, vector<1x8x8x4xf32>,
    return
  }
  func.func @transform_0(%arg0: i32, %arg1: i32) -> (i32, i32, i32, i32, i32) {
    %c0_i32 = arith.constant 0 : i32
    %c0_i32_0 = arith.constant 0 : i32
    %c0_i32_1 = arith.constant 0 : i32
    %c0_i32_2 = arith.constant 0 : i32
    return %arg0, %arg1, %c0_i32, %c0_i32_0, %c0_i32_1 : i32, i32, i32, i32, i32
  }
  func.func @transform_1(%arg0: i32, %arg1: i32) -> (i32, i32, i32, i32) {
    %c0_i32 = arith.constant 0 : i32
    %c0_i32_0 = arith.constant 0 : i32
    %c0_i32_1 = arith.constant 0 : i32
    return %arg0, %arg1, %c0_i32, %c0_i32_0 : i32, i32, i32, i32
  }
  func.func @transform_2(%arg0: i32, %arg1: i32) -> (i32, i32, i32, i32) {
    %c0_i32 = arith.constant 0 : i32
    %c0_i32_0 = arith.constant 0 : i32
    %c0_i32_1 = arith.constant 0 : i32
    return %arg0, %arg1, %c0_i32, %c0_i32_0 : i32, i32, i32, i32
  }
}

</mosaic_0001>

<bundles_post_ra>
// kernel: tpu_custom_call.1
= control target key start
LH: loop header
LB: loop body
LE: loop exit
PB: predicated region body
PF: predicated region fallthrough
CT: control target
= control target key end

     0   :  { %8 = vsyncpa [#allocation3], 0  ;;  %s816_s0 = inlined_call_operand.hbm [shape: f32[2,8,2,8,8], index: 0, kind: input, shape index: {}]   ;;  %s817_s1 = inlined_call_operand.vmem [shape: f32[2,8,8,4], index: 1, kind: output, shape index: {0}]   ;;  %s818_s2 = inlined_call_operand.vmem [shape: f32[2,8,8,4], index: 2, kind: output, shape index: {1}]  }
   0x1   :  { %10 = vsyncpa [#allocation3 + $0x1], 0  ;;  %s653_s9 = smov 0   ;;  %s655_s10 = smov 0  }
   0x2   :  { %s657_s11 = smov 0   ;;  %s659_s12 = smov 0  }
   0x3   :  { %s661_s13 = smov 0   ;;  %s663_s14 = smov 0  }
   0x4 LB: > { %s468_s15 = sadd.s32 4294967295, %s632_s14   ;;  %s28_s16 = sadd.s32 1, %s628_s13  ;;  %s632_s14 = sphi %s663_s14, %s16_s14   ;;  %s628_s13 = sphi %s661_s13, %s826_s13   ;;  %s624_s12 = sphi %s659_s12, %s825_s12   ;;  %s620_s11 = sphi %s657_s11, %s824_s11   ;;  %s616_s10 = sphi %s655_s10, %s823_s10   ;;  %s612_s9 = sphi %s653_s9, %s822_s9  }
   0x5   : > { %p30_p0 = scmp.ge.s32.totalorder %s28_s16, 2  ;;  %s37_s17 = sadd.s32 1, %s620_s11 }
   0x6   : > { %p44_p1 = scmp.ne.s32.totalorder %s620_s11, %s616_s10  ;;  %p45_p2 = scmp.eq.s32.totalorder %s632_s14, 0 }
   0x7   : > { %s828_s16 = smov (%p30_p0, %s28_s16), 0  ;;  %p50_p4 = scmp.ne.s32.totalorder %s616_s10, %s612_s9 }
   0x8   : > { %p689_p3 = por %p45_p2, %p44_p1  ;;  %s32_s19 = ssub.s32 %s628_s13, %s828_s16 }
   0x9   : > { %p51_p5 = scmp.eq.s32.totalorder %s468_s15, 0  ;;  %p35_p6 = scmp.eq.s32.totalorder %s32_s19, 0 }
   0xa   : > { %p500_p8 = scmp.lt.s32.totalorder %s632_s14, 2  ;;  %s130_s22 = sand.u32 1, %s620_s11  }
   0xb   : > { %p696_p7 = por %p51_p5, %p50_p4  ;;  %s491_s23 = sshll.u32 %s628_s13, 11 }
   0xc   : > { %s702_s21 = scalar_select %p35_p6, %s620_s11, %s37_s17  }
   0xd   : > { %s472_s24 = sshll.u32 %s130_s22, 7  ;;  %s709_s27 = scalar_lea.hbm %s816_s0, %s491_s23 }
   0xe   : > { %s134_s28 = scalar_lea.vmem [#allocation2], %s472_s24  ;;  %p713_p9 = pnand %p500_p8, %p689_p3 }
   0xf   : > { %s144_s29 = sshll.u32 %s134_s28, 4  ;;  %s719_s3 = scalar_lea.sflag [#allocation3], %s130_s22  ;;  %s717_s29 = int_to_ptr.vmem [resolvable:$true] %s144_s29 }
  0x10   : > { %s552_s4 = scalar_lea.hbm %s709_s27, 2048  ;;  %p554_p11 = pneg %p713_p9 }
  0x11   : > { %p553_p10 = scmp.ne.s32.totalorder %s709_s27, %s552_s4  ;;  %s557_s7 = scalar_lea.hbm %s816_s0, 4096 }
  0x12   : > { %p558_p0 = scmp.lt.u32.totalorder %s709_s27, %s816_s0  ;;  %p559_p1 = scmp.lt.u32.totalorder %s557_s7, %s552_s4 }
  0x13   : > { %p555_p12 = pnand %p554_p11, %p553_p10  ;;  %p561_p3 = scmp.lt.u32.totalorder %s552_s4, %s709_s27 }
  0x14   : > { %p560_p2 = por %p559_p1, %p558_p0 }
  0x15   : > { %p556_p13 = pneg %p555_p12 }
  0x16   : > { %p562_p4 = por %p561_p3, %p560_p2 }
  0x18   : > { %p563_p5 = pnand %p562_p4, %p556_p13 }
  0x1a   : > { %566 = shalt.err (!%p563_p5)
}
  0x1b   : > { %s567_s15 = scalar_lea.vmem %s717_s29, 2048  ;;  %s634_s17 = smov [#allocation2]  }
  0x1c   : > { %p568_p6 = scmp.ne.s32.totalorder %s717_s29, %s567_s15  ;;  %s572_s18 = sshll.u32 %s634_s17, 4  ;;  %s573_s18 = int_to_ptr.vmem [resolvable:$false] %s572_s18 }
  0x1d   : > { %s574_s19 = scalar_lea.vmem %s573_s18, 4096  ;;  %p575_p12 = scmp.lt.s32.totalorder %s717_s29, %s573_s18 }
  0x1e   : > { %p570_p8 = pnand %p568_p6, %p554_p11  ;;  %p576_p0 = scmp.lt.s32.totalorder %s574_s19, %s567_s15 }
  0x20   : > { %p571_p10 = pneg %p570_p8  ;;  %p577_p1 = por %p576_p0, %p575_p12 }
  0x22   : > { %p578_p2 = pnand %p577_p1, %p571_p10 }
  0x24   : > { %581 = shalt.err (!%p578_p2)
}
  0x25   : > { %s635_s22 = smov 128   ;;  %s636_s23 = smov 8  }
  0x26   : > { %499 = dma.hbm_to_vmem [thread:$0]  (!%p713_p9), %s709_s27, 2048, %s717_s29, %s719_s3, %s635_s22, %s635_s22, %s636_s23  }
  0x27   : > { %p475_p11 = scmp.ge.s32.totalorder %s632_s14, 1  ;;  %p152_p13 = scmp.lt.s32.totalorder %s632_s14, 3 }
  0x29   : > { %p153_p3 = pnand %p475_p11, %p152_p13 }
  0x2a   : > { %s158_s24 = sand.u32 (!%p153_p3), 1, %s616_s10  }
  0x2b   : > { %156 = sbr.rel (%p153_p3) target bundleno = 189 (0xbd), region = 24  ;;  %s476_s25 = sshll.u32 (!%p153_p3), %s158_s24, 7 }
  0x2c   : > { %s159_s26 = scalar_lea.sflag (!%p153_p3), [#allocation3], %s158_s24  ;;  %s162_s28 = scalar_lea.vmem (!%p153_p3), [#allocation2], %s476_s25 }
  0x32   : > { %607 = dma.done.wait (%p696_p7), %s159_s26, 2048  }
  0x33   : > { %609 = vsyncadd (%p696_p7), %s159_s26, 4294965248  ;;  %v219_v0 = vld [vmem:[%s162_s28 + $0x20] sm:$0xff]  ;;  %v483_v1 = vld [vmem:[%s162_s28 + $0x28] sm:$0xff]  ;;  %s637_s27 = smov 124   ;;  %p198_p7 = scmp.lt.s32.totalorder %s624_s12, 1  ;;  %vm306_vm0 = vcmask 31744  }
  0x34   : > { %v217_v2 = vld [vmem:[%s162_s28] sm:$0xff]  ;;  %v236_v3 = vadd.f32 %v483_v1, %v219_v0  ;;  %v481_v4 = vld [vmem:[%s162_s28 + $0x8] sm:$0xff]  ;;  %v220_v5 = vld [vmem:[%s162_s28 + $0x30] sm:$0xff]  ;;  %v292_v25 = vmul.f32 2.0, %v219_v0 }
  0x35   : > { %v484_v6 = vld [vmem:[%s162_s28 + $0x38] sm:$0xff]  ;;  %v234_v7 = vadd.f32 %v481_v4, %v217_v2  ;;  %v218_v8 = vld [vmem:[%s162_s28 + $0x10] sm:$0xff]  ;;  %v221_v14 = vld [vmem:[%s162_s28 + $0x40] sm:$0xff]  ;;  %s830_s12 = smov (!%p198_p7, %s624_s12), 1  ;;  %v290_v28 = vmul.f32 2.0, %v217_v2  ;;  %v293_v34 = vmul.f32 2.0, %v220_v5 }
  0x36   : > { %v482_v9 = vld [vmem:[%s162_s28 + $0x18] sm:$0xff]  ;;  %254 = vrot.lane.b32.xlu1 %v236_v3, %s637_s27  ;;  %v237_v10 = vadd.f32 %v484_v6, %v220_v5  ;;  %v222_v12 = vld [vmem:[%s162_s28 + $0x50] sm:$0xff]  ;;  %v485_v15 = vld [vmem:[%s162_s28 + $0x48] sm:$0xff]  ;;  %s492_s20 = sshll.u32 %s830_s12, 6  ;;  %v291_v38 = vmul.f32 2.0, %v218_v8  ;;  %v294_v48 = vmul.f32 2.0, %v221_v14 }
  0x37   : > { %250 = vrot.lane.b32.xlu0 %v234_v7, %s637_s27  ;;  %v235_v11 = vadd.f32 %v482_v9, %v218_v8  ;;  %v486_v13 = vld [vmem:[%s162_s28 + $0x58] sm:$0xff]  ;;  %v238_v17 = vadd.f32 %v485_v15, %v221_v14  ;;  %v224_v18 = vld [vmem:[%s162_s28 + $0x70] sm:$0xff]  ;;  %v223_v20 = vld [vmem:[%s162_s28 + $0x60] sm:$0xff]  ;;  %s759_s3 = scalar_lea.vmem %s817_s1, %s492_s20  ;;  %s764_s6 = scalar_lea.vmem %s818_s2, %s492_s20  ;;  %v295_v44 = vmul.f32 2.0, %v222_v12 }
  0x38   : > { %v239_v16 = vadd.f32 %v486_v13, %v222_v12  ;;  %v488_v19 = vld [vmem:[%s162_s28 + $0x78] sm:$0xff]  ;;  %v487_v21 = vld [vmem:[%s162_s28 + $0x68] sm:$0xff]  ;;  %v297_v54 = vmul.f32 2.0, %v224_v18  ;;  %v296_v58 = vmul.f32 2.0, %v223_v20 }
  0x39   : > { %v241_v22 = vadd.f32 %v488_v19, %v224_v18  ;;  %v240_v23 = vadd.f32 %v487_v21, %v223_v20 }
  0x3a   : > { %256 = vrot.lane.b32.xlu1 %v237_v10, %s637_s27 }
  0x3b   : > { %252 = vrot.lane.b32.xlu0 %v235_v11, %s637_s27 }
  0x3e   : > { %260 = vrot.lane.b32.xlu1 %v239_v16, %s637_s27 }
  0x3f   : > { %258 = vrot.lane.b32.xlu0 %v238_v17, %s637_s27 }
  0x42   : > { %264 = vrot.lane.b32.xlu1 %v241_v22, %s637_s27 }
  0x43   : > { %262 = vrot.lane.b32.xlu0 %v240_v23, %s637_s27 }
  0xa8   : > { %v255_v24 = vpop.permute.xlu1 %254 }
  0xa9   : > { %v276_v26 = vadd.f32 %v255_v24, %v236_v3  ;;  %v251_v27 = vpop.permute.xlu0 %250 }
  0xaa   : > { %v274_v29 = vadd.f32 %v251_v27, %v234_v7 }
  0xab   : > { %v284_v30 = vmul.f32 0.5, %v276_v26 }
  0xac   : > { %v282_v31 = vmul.f32 0.5, %v274_v29  ;;  %v257_v32 = vpop.permute.xlu1 %256 }
  0xad   : > { %v300_v33 = vsub.f32 %v292_v25, %v284_v30  ;;  %309 = vst.msk [vmem:[%s759_s3 + $0x10] sm:$0xff] %vm306_vm0, %v284_v30  ;;  %v277_v35 = vadd.f32 %v257_v32, %v237_v10  ;;  %v253_v36 = vpop.permute.xlu0 %252 }
  0xae   : > { %v298_v37 = vsub.f32 %v290_v28, %v282_v31  ;;  %307 = vst.msk [vmem:[%s759_s3] sm:$0xff] %vm306_vm0, %v282_v31  ;;  %v275_v39 = vadd.f32 %v253_v36, %v235_v11 }
  0xaf   : > { %317 = vst.msk [vmem:[%s764_s6 + $0x10] sm:$0xff] %vm306_vm0, %v300_v33  ;;  %v285_v40 = vmul.f32 0.5, %v277_v35 }
  0xb0   : > { %315 = vst.msk [vmem:[%s764_s6] sm:$0xff] %vm306_vm0, %v298_v37  ;;  %v283_v41 = vmul.f32 0.5, %v275_v39  ;;  %v261_v42 = vpop.permute.xlu1 %260 }
  0xb1   : > { %v301_v43 = vsub.f32 %v293_v34, %v285_v40  ;;  %310 = vst.msk [vmem:[%s759_s3 + $0x18] sm:$0xff] %vm306_vm0, %v285_v40  ;;  %v279_v45 = vadd.f32 %v261_v42, %v239_v16  ;;  %v259_v46 = vpop.permute.xlu0 %258 }
  0xb2   : > { %v299_v47 = vsub.f32 %v291_v38, %v283_v41  ;;  %308 = vst.msk [vmem:[%s759_s3 + $0x8] sm:$0xff] %vm306_vm0, %v283_v41  ;;  %v278_v49 = vadd.f32 %v259_v46, %v238_v17 }
  0xb3   : > { %318 = vst.msk [vmem:[%s764_s6 + $0x18] sm:$0xff] %vm306_vm0, %v301_v43  ;;  %v287_v50 = vmul.f32 0.5, %v279_v45 }
  0xb4   : > { %316 = vst.msk [vmem:[%s764_s6 + $0x8] sm:$0xff] %vm306_vm0, %v299_v47  ;;  %v286_v51 = vmul.f32 0.5, %v278_v49  ;;  %v265_v52 = vpop.permute.xlu1 %264 }
  0xb5   : > { %v303_v53 = vsub.f32 %v295_v44, %v287_v50  ;;  %312 = vst.msk [vmem:[%s759_s3 + $0x28] sm:$0xff] %vm306_vm0, %v287_v50  ;;  %v281_v55 = vadd.f32 %v265_v52, %v241_v22  ;;  %v263_v56 = vpop.permute.xlu0 %262 }
  0xb6   : > { %v302_v57 = vsub.f32 %v294_v48, %v286_v51  ;;  %311 = vst.msk [vmem:[%s759_s3 + $0x20] sm:$0xff] %vm306_vm0, %v286_v51  ;;  %v280_v59 = vadd.f32 %v263_v56, %v240_v23 }
  0xb7   : > { %320 = vst.msk [vmem:[%s764_s6 + $0x28] sm:$0xff] %vm306_vm0, %v303_v53  ;;  %v289_v60 = vmul.f32 0.5, %v281_v55 }
  0xb8   : > { %319 = vst.msk [vmem:[%s764_s6 + $0x20] sm:$0xff] %vm306_vm0, %v302_v57  ;;  %v288_v61 = vmul.f32 0.5, %v280_v59 }
  0xb9   : > { %v305_v62 = vsub.f32 %v297_v54, %v289_v60  ;;  %314 = vst.msk [vmem:[%s759_s3 + $0x38] sm:$0xff] %vm306_vm0, %v289_v60 }
  0xba   : > { %v304_v63 = vsub.f32 %v296_v58, %v288_v61  ;;  %313 = vst.msk [vmem:[%s759_s3 + $0x30] sm:$0xff] %vm306_vm0, %v288_v61 }
  0xbb   : > { %322 = vst.msk [vmem:[%s764_s6 + $0x38] sm:$0xff] %vm306_vm0, %v305_v62 }
  0xbc   : > { %321 = vst.msk [vmem:[%s764_s6 + $0x30] sm:$0xff] %vm306_vm0, %v304_v63 }
  0xbd PF: > { %s16_s14 = sadd.s32 1, %s632_s14   ;;  %s822_s9 = smov %s616_s10 }
  0xbe   : > { %p13_p9 = scmp.ge.s32.totalorder %s16_s14, 4   ;;  %s823_s10 = smov %s620_s11 }
  0xbf   : > { %s824_s11 = smov %s702_s21  ;;  %s825_s12 = smov %s628_s13 }
  0xc0   : > { %s826_s13 = smov %s828_s16  ;;  %15 = sbr.rel (!%p13_p9) target bundleno = 4 (0x4), region = 77 }
  0xc7   :  { %378 = vsyncpa [#allocation3], 1 }
  0xc8   :  { %380 = vsyncpa [#allocation3 + $0x1], 1 }

</bundles_post_ra>
